<compile_context>
chip_gen: v7x
topology: tpu7x:2x2x1
jax: 0.10.0
libtpu: 0.0.40
codegen_flags: <defaults>
</compile_context>

<pallas_src>
import jax
import jax.numpy as jnp
from jax import lax
from jax.experimental import pallas as pl
from jax.experimental.pallas import tpu as pltpu

N_EMBD = 384       # n_embd of the module
HEAD_SIZE = 64     # head_size argument to Head(head_size)


def _head_kernel(x_ref, w_ref, o_ref):
    # x_ref: (1, T, C) f32 ; w_ref: (C, 3H) bf16 (query part pre-scaled)
    # o_ref: (1, T, H) f32
    H = HEAD_SIZE
    x = x_ref[0].astype(jnp.bfloat16)                          # (T, C) bf16 MXU input
    w = w_ref[...]                                             # (C, 3H) bf16

    # Fused q/k/v projection: one wide matmul, f32 accumulation.
    qkv = jnp.dot(x, w, preferred_element_type=jnp.float32)    # (T, 3H) f32
    q = qkv[:, 0 * H:1 * H].astype(jnp.bfloat16)               # already scaled by H**-0.5
    k = qkv[:, 1 * H:2 * H].astype(jnp.bfloat16)
    v = qkv[:, 2 * H:3 * H].astype(jnp.bfloat16)

    # scores = q @ k^T: contract the head axis of both operands (no explicit .T).
    wei = lax.dot_general(q, k, (((1,), (1,)), ((), ())),
                          preferred_element_type=jnp.float32)  # (T, T) f32

    T = wei.shape[0]
    row = lax.broadcasted_iota(jnp.int32, (T, T), 0)
    col = lax.broadcasted_iota(jnp.int32, (T, T), 1)
    wei = jnp.where(row >= col, wei, jnp.float32(-1e30))       # causal (tril) mask

    # Numerically-stable softmax along the last axis (kept in f32).
    wei_max = jnp.max(wei, axis=-1, keepdims=True)
    e = jnp.exp(wei - wei_max)
    denom = jnp.sum(e, axis=-1, keepdims=True)
    p = e * pl.reciprocal(denom, approx=True)                  # (T, T)

    # TODO(synk): nn.Dropout(0.2) on the attention weights is identity in eval
    # mode; training-mode dropout (torch RNG) is not reproduced here.

    out = jnp.dot(p.astype(jnp.bfloat16), v,
                  preferred_element_type=jnp.float32)          # (T, H) f32
    o_ref[0] = out.astype(o_ref.dtype)


def make_qkv_weight(w_key, w_query, w_value):
    """Fold the torch-style (H, C) weights of key/query/value into a single
    (C, 3H) bf16 matrix with the attention scale baked into the query part.
    Call ONCE per parameter set, outside the per-token hot path."""
    scale = jnp.float32(HEAD_SIZE) ** -0.5
    wq = w_query.astype(jnp.float32).T * scale    # (C, H), pre-scaled
    wk = w_key.astype(jnp.float32).T              # (C, H)
    wv = w_value.astype(jnp.float32).T            # (C, H)
    return jnp.concatenate([wq, wk, wv], axis=1).astype(jnp.bfloat16)  # (C, 3H)


def head_forward(x, w_qkv):
    """x: (B, T, C) f32 ; w_qkv: (C, 3H) bf16 from make_qkv_weight()."""
    B, T, C = x.shape
    H3 = w_qkv.shape[1]
    H = H3 // 3

    return pl.pallas_call(
        _head_kernel,
        out_shape=jax.ShapeDtypeStruct((B, T, H), jnp.float32),
        grid_spec=pltpu.PrefetchScalarGridSpec(
            num_scalar_prefetch=0,
            grid=(B,),
            in_specs=[
                pl.BlockSpec((1, T, C), lambda b: (b, 0, 0)),
                pl.BlockSpec((C, H3), lambda b: (0, 0)),   # constant index -> resident weights
            ],
            out_specs=pl.BlockSpec((1, T, H), lambda b: (b, 0, 0)),
        ),
        compiler_params=pltpu.CompilerParams(
            dimension_semantics=("parallel",)),
    )(x, w_qkv)


def _reference(x, w_key, w_query, w_value):
    k = x @ w_key.T
    q = x @ w_query.T
    v = x @ w_value.T
    wei = (q @ jnp.swapaxes(k, -2, -1)) * (k.shape[-1] ** -0.5)
    T = x.shape[1]
    mask = jnp.tril(jnp.ones((T, T), dtype=bool))
    wei = jnp.where(mask, wei, -jnp.inf)
    wei = jax.nn.softmax(wei, axis=-1)
    return wei @ v


if __name__ == "__main__":
    key = jax.random.PRNGKey(0)
    kx, kk, kq, kv = jax.random.split(key, 4)

    B, T = 2, 64   # small seq; block_size=256 only upper-bounds T in the module
    x = jax.random.normal(kx, (B, T, N_EMBD), dtype=jnp.float32)

    # deterministic parameter init (shapes from nn.Linear(n_embd, head_size, bias=False))
    bound = 1.0 / (N_EMBD ** 0.5)
    w_key_p = jax.random.uniform(kk, (HEAD_SIZE, N_EMBD), jnp.float32, -bound, bound)
    w_query_p = jax.random.uniform(kq, (HEAD_SIZE, N_EMBD), jnp.float32, -bound, bound)
    w_value_p = jax.random.uniform(kv, (HEAD_SIZE, N_EMBD), jnp.float32, -bound, bound)

    w_qkv = make_qkv_weight(w_key_p, w_query_p, w_value_p)   # once, outside the hot path

    out = head_forward(x, w_qkv)
    out = jax.block_until_ready(out)

    ref = _reference(x, w_key_p, w_query_p, w_value_p)
    assert out.shape == (B, T, HEAD_SIZE)
    # bf16 MXU inputs (f32 accumulation) -> relaxed tolerance vs. the pure-f32 reference
    max_err = float(jnp.max(jnp.abs(out - ref)))
    assert jnp.allclose(out, ref, atol=3e-2, rtol=3e-2), max_err
    print("KERNEL_OK")
</pallas_src>

<mosaic_0001>
module attributes {stable_mosaic.version = 11 : i64} {
  func.func @_head_kernel(%arg0: i32, %arg1: memref<1x64x384xf32, #tpu.memory_space<vmem>>, %arg2: memref<384x192xbf16, #tpu.memory_space<vmem>>, %arg3: memref<1x64x64xf32, #tpu.memory_space<vmem>>) attributes {dimension_semantics = [#tpu.dimension_semantics<parallel>], iteration_bounds = array<i64: 2>, scalar_prefetch = 0 : i64, scratch_operands = 0 : i64, tpu.core_type = #tpu.core_type<tc>, window_params = [{transform_indices = @transform_0, window_bounds = array<i64: 1, 64, 384>}, {pipeline_mode = #tpu.pipeline_mode<synchronous>, transform_indices = @transform_1, window_bounds = array<i64: 384, 192>}, {transform_indices = @transform_2, window_bounds = array<i64: 1, 64, 64>}]} {
    %c0 = arith.constant 0 : index
    %c0_0 = arith.constant 0 : index
    %c0_1 = arith.constant 0 : index
    %0 = vector.load %arg1[%c0, %c0_0, %c0_1] : memref<1x64x384xf32, #tpu.memory_space<vmem>>, vector<1x64x384xf32>
    %1 = vector.shape_cast %0 : vector<1x64x384xf32> to vector<64x384xf32>
    %2 = arith.truncf %1 : vector<64x384xf32> to vector<64x384xbf16>
    %c0_2 = arith.constant 0 : index
    %c0_3 = arith.constant 0 : index
    %3 = vector.load %arg2[%c0_2, %c0_3] : memref<384x192xbf16, #tpu.memory_space<vmem>>, vector<384x192xbf16>
    %cst = arith.constant dense<0.000000e+00> : vector<64x192xf32>
    %4 = tpu.matmul %2, %3, %cst {dimension_numbers = #tpu.dot_dimension_numbers<[1], [0], [0], [1], [0, 0, 1, 1], [], []>} : vector<64x384xbf16>, vector<384x192xbf16>, vector<64x192xf32> -> vector<64x192xf32>
    %5 = vector.extract_strided_slice %4 {offsets = [0, 0], sizes = [64, 64], strides = [1, 1]} : vector<64x192xf32> to vector<64x64xf32>
    %6 = arith.truncf %5 : vector<64x64xf32> to vector<64x64xbf16>
    %7 = vector.extract_strided_slice %4 {offsets = [0, 64], sizes = [64, 64], strides = [1, 1]} : vector<64x192xf32> to vector<64x64xf32>
    %8 = arith.truncf %7 : vector<64x64xf32> to vector<64x64xbf16>
    %9 = vector.extract_strided_slice %4 {offsets = [0, 128], sizes = [64, 64], strides = [1, 1]} : vector<64x192xf32> to vector<64x64xf32>
    %10 = arith.truncf %9 : vector<64x64xf32> to vector<64x64xbf16>
    %cst_4 = arith.constant dense<0.000000e+00> : vector<64x64xf32>
    %11 = tpu.matmul %6, %8, %cst_4 {dimension_numbers = #tpu.dot_dimension_numbers<[1], [1], [0], [0], [0, 0, 1, 0], [], []>} : vector<64x64xbf16>, vector<64x64xbf16>, vector<64x64xf32> -> vector<64x64xf32>
    %12 = tpu.iota {dimensions = array<i32: 0>} : vector<64x64xi32>
    %13 = tpu.iota {dimensions = array<i32: 1>} : vector<64x64xi32>
    %14 = arith.cmpi sge, %12, %13 : vector<64x64xi32>
    %cst_5 = arith.constant -1.000000e+30 : f32
    %15 = vector.broadcast %cst_5 : f32 to vector<64x64xf32>
    %16 = arith.select %14, %11, %15 : vector<64x64xi1>, vector<64x64xf32>
    %cst_6 = arith.constant dense<0xFF800000> : vector<64xf32>
    %17 = vector.multi_reduction <maximumf>, %16, %cst_6 [1] : vector<64x64xf32> to vector<64xf32>
    %18 = vector.shape_cast %17 : vector<64xf32> to vector<64x1xf32>
    %19 = vector.broadcast %18 : vector<64x1xf32> to vector<64x64xf32>
    %20 = arith.subf %16, %19 : vector<64x64xf32>
    %21 = math.exp %20 : vector<64x64xf32>
    %cst_7 = arith.constant dense<0.000000e+00> : vector<64xf32>
    %22 = vector.multi_reduction <add>, %21, %cst_7 [1] : vector<64x64xf32> to vector<64xf32>
    %23 = vector.shape_cast %22 : vector<64xf32> to vector<64x1xf32>
    %24 = tpu.reciprocal %23 {approx = true} : vector<64x1xf32> -> vector<64x1xf32>
    %25 = vector.broadcast %24 : vector<64x1xf32> to vector<64x64xf32>
    %26 = arith.mulf %21, %25 : vector<64x64xf32>
    %27 = arith.truncf %26 : vector<64x64xf32> to vector<64x64xbf16>
    %cst_8 = arith.constant dense<0.000000e+00> : vector<64x64xf32>
    %28 = tpu.matmul %27, %10, %cst_8 {dimension_numbers = #tpu.dot_dimension_numbers<[1], [0], [0], [1], [0, 0, 1, 1], [], []>} : vector<64x64xbf16>, vector<64x64xbf16>, vector<64x64xf32> -> vector<64x64xf32>
    %c0_9 = arith.constant 0 : index
    %c0_10 = arith.constant 0 : index
    %c0_11 = arith.constant 0 : index
    %29 = vector.load %arg3[%c0_9, %c0_10, %c0_11] : memref<1x64x64xf32, #tpu.memory_space<vmem>>, vector<1x64x64xf32>
    %30 = vector.shape_cast %29 : vector<1x64x64xf32> to vector<64x64xf32>
    %31 = vector.shape_cast %28 : vector<64x64xf32> to vector<1x64x64xf32>
    tpu.vector_store %arg3[%c0_9, %c0_10, %c0_11], %31 {strides = array<i32>} : memref<1x64x64xf32, #tpu.memory_space<vmem>>, vector<1x64x64xf32>,
    return
  }
  func.func @transform_0(%arg0: i32) -> (i32, i32, i32) {
    %c0_i32 = arith.constant 0 : i32
    %c0_i32_0 = arith.constant 0 : i32
    %c0_i32_1 = arith.constant 0 : i32
    return %arg0, %c0_i32, %c0_i32_0 : i32, i32, i32
  }
  func.func @transform_1(%arg0: i32) -> (i32, i32) {
    %c0_i32 = arith.constant 0 : i32
    %c0_i32_0 = arith.constant 0 : i32
    %c0_i32_1 = arith.constant 0 : i32
    return %c0_i32, %c0_i32_0 : i32, i32
  }
  func.func @transform_2(%arg0: i32) -> (i32, i32, i32) {
    %c0_i32 = arith.constant 0 : i32
    %c0_i32_0 = arith.constant 0 : i32
    %c0_i32_1 = arith.constant 0 : i32
    return %arg0, %c0_i32, %c0_i32_0 : i32, i32, i32
  }
}

</mosaic_0001>

<bundles_post_ra>
// kernel: tpu_custom_call.1
= control target key start
LH: loop header
LB: loop body
LE: loop exit
PB: predicated region body
PF: predicated region fallthrough
CT: control target
= control target key end

     0   :  { %7 = vsyncpa [#allocation3], 0  ;;  %s1692_s0 = inlined_call_operand.vmem [shape: f32[2,64,384], index: 0, kind: input, shape index: {}]   ;;  %s1693_s1 = inlined_call_operand.vmem [shape: bf16[384,192], index: 1, kind: input, shape index: {}]   ;;  %s1694_s2 = inlined_call_operand.hbm [shape: f32[2,64,64], index: 2, kind: output, shape index: {}]  }
   0x1   :  { %9 = vsyncpa [#allocation3 + $0x1], 0  ;;  %s1371_s9 = smov 0   ;;  %s1373_s10 = smov 0  }
   0x2   :  { %s1375_s11 = smov 0   ;;  %s1377_s12 = smov 0  }
   0x3 LB: > { %s1392_s13 = sadd.s32 4294967295, %s1349_s12   ;;  %s1003_s14 = sadd.s32 4294967294, %s1349_s12   ;;  %s1349_s12 = sphi %s1377_s12, %s1700_s12   ;;  %s1345_s11 = sphi %s1375_s11, %s1699_s11   ;;  %s1341_s10 = sphi %s1373_s10, %s1698_s10   ;;  %s1337_s9 = sphi %s1371_s9, %s1697_s9  }
   0x4   : > { %s1396_s15 = sadd.s32 1, %s1349_s12   ;;  %s69_s16 = sadd.s32 1, %s1345_s11 }
   0x5   : > { %s66_s17 = ssub.s32 %s1349_s12, %s1396_s15  ;;  %p79_p0 = scmp.ne.s32.totalorder %s1345_s11, %s1341_s10 }
   0x6   : > { %p67_p1 = scmp.eq.s32.totalorder %s66_s17, 0  ;;  %p80_p2 = scmp.eq.s32.totalorder %s1392_s13, 1 }
   0x7   : > { %p85_p3 = scmp.ne.s32.totalorder %s1341_s10, %s1337_s9  ;;  %p86_p4 = scmp.eq.s32.totalorder %s1003_s14, 1 }
   0x8   : > { %s1407_s18 = scalar_select %p67_p1, %s1345_s11, %s69_s16  }
   0x9   : > { %p1409_p5 = por %p80_p2, %p79_p0  ;;  %p1413_p6 = por %p86_p4, %p85_p3 }
   0xa   : > { %p1006_p7 = scmp.ge.s32.totalorder %s1349_s12, 1  ;;  %p115_p8 = scmp.lt.s32.totalorder %s1349_s12, 3 }
   0xc   : > { %p116_p9 = pnand %p1006_p7, %p115_p8 }
   0xd   : > { %v1183_v0 = vld [vmem:[%s1693_s1 + $0x4] ss:$8 sps:$4 sm:$0xff] (!%p116_p9)   ;;  %v1185_v1 = vld [vmem:[%s1693_s1] ss:$8 sps:$4 sm:$0xff] (!%p116_p9)   ;;  %v1351_v2 = vmov (!%p116_p9), 0   ;;  %p137_p10 = scmp.lt.s32.totalorder (!%p116_p9), %s1392_s13, 1 }
   0xe   : > { %119 = sbr.rel (%p116_p9) target bundleno = 1221 (0x4c5), region = 28  ;;  %572 = vmatprep.mubr.bf16.mxu1 (!%p116_p9), %v1351_v2  ;;  %467 = vmatprep.subr.bf16.mxu0 (!%p116_p9), %v1183_v0  ;;  %v1186_v3 = vld [vmem:[%s1693_s1 + $0x14] ss:$8 sps:$4 sm:$0xff] (!%p116_p9)   ;;  %v1188_v4 = vld [vmem:[%s1693_s1 + $0x10] ss:$8 sps:$4 sm:$0xff] (!%p116_p9)   ;;  %vm633_vm0 = vcmask (!%p116_p9), 523264  }
   0xf   : > { %468 = vmatpush1.bf16.msra.mxu0 (!%p116_p9), %v1185_v1  ;;  %v1189_v5 = vld [vmem:[%s1693_s1 + $0x24] ss:$8 sps:$4 sm:$0xff] (!%p116_p9)   ;;  %v1191_v6 = vld [vmem:[%s1693_s1 + $0x20] ss:$8 sps:$4 sm:$0xff] (!%p116_p9)   ;;  %v1192_v7 = vld [vmem:[%s1693_s1 + $0x34] ss:$8 sps:$4 sm:$0xff] (!%p116_p9)  }
  0x10   : > { %469 = vmatprep.subr.bf16.mxu0 (!%p116_p9), %v1186_v3  ;;  %v1194_v8 = vld [vmem:[%s1693_s1 + $0x30] ss:$8 sps:$4 sm:$0xff] (!%p116_p9)   ;;  %v1207_v9 = vld [vmem:[%s1693_s1 + $0x104] ss:$8 sps:$4 sm:$0xff] (!%p116_p9)   ;;  %v1209_v10 = vld [vmem:[%s1693_s1 + $0x100] ss:$8 sps:$4 sm:$0xff] (!%p116_p9)  }
  0x11   : > { %v1195_v11 = vld [vmem:[%s1693_s1 + $0x44] ss:$8 sps:$4 sm:$0xff] (!%p116_p9)   ;;  %540 = vmatprep.subr.bf16.mxu1 (!%p116_p9), %v1207_v9  ;;  %v1213_v12 = vld [vmem:[%s1693_s1 + $0x114] ss:$8 sps:$4 sm:$0xff] (!%p116_p9)   ;;  %v1215_v13 = vld [vmem:[%s1693_s1 + $0x110] ss:$8 sps:$4 sm:$0xff] (!%p116_p9)  }
  0x12   : > { %541 = vmatpush1.bf16.msra.mxu1 (!%p116_p9), %v1209_v10  ;;  %v1197_v14 = vld [vmem:[%s1693_s1 + $0x40] ss:$8 sps:$4 sm:$0xff] (!%p116_p9)   ;;  %v1198_v15 = vld [vmem:[%s1693_s1 + $0x54] ss:$8 sps:$4 sm:$0xff] (!%p116_p9)   ;;  %v1219_v16 = vld [vmem:[%s1693_s1 + $0x124] ss:$8 sps:$4 sm:$0xff] (!%p116_p9)  }
  0x13   : > { %470 = vmatpush1.bf16.msra.mxu0 (!%p116_p9), %v1188_v4  ;;  %542 = vmatprep.subr.bf16.mxu1 (!%p116_p9), %v1213_v12  ;;  %v1221_v17 = vld [vmem:[%s1693_s1 + $0x120] ss:$8 sps:$4 sm:$0xff] (!%p116_p9)   ;;  %v1200_v18 = vld [vmem:[%s1693_s1 + $0x50] ss:$8 sps:$4 sm:$0xff] (!%p116_p9)   ;;  %v1225_v19 = vld [vmem:[%s1693_s1 + $0x134] ss:$8 sps:$4 sm:$0xff] (!%p116_p9)  }
  0x14   : > { %471 = vmatprep.subr.bf16.mxu0 (!%p116_p9), %v1189_v5  ;;  %v1201_v20 = vld [vmem:[%s1693_s1 + $0x64] ss:$8 sps:$4 sm:$0xff] (!%p116_p9)   ;;  %v1227_v21 = vld [vmem:[%s1693_s1 + $0x130] ss:$8 sps:$4 sm:$0xff] (!%p116_p9)   ;;  %v1203_v22 = vld [vmem:[%s1693_s1 + $0x60] ss:$8 sps:$4 sm:$0xff] (!%p116_p9)  }
  0x15   : > { %v1231_v23 = vld [vmem:[%s1693_s1 + $0x144] ss:$8 sps:$4 sm:$0xff]   ;;  %s138_s29 = scalar_select %p137_p10, %s1392_s13, 1  ;;  %v1204_v24 = vld [vmem:[%s1693_s1 + $0x74] ss:$8 sps:$4 sm:$0xff]  }
  0x16   : > { %543 = vmatpush1.bf16.msra.mxu1 %v1215_v13  ;;  %v1233_v25 = vld [vmem:[%s1693_s1 + $0x140] ss:$8 sps:$4 sm:$0xff]   ;;  %v1206_v26 = vld [vmem:[%s1693_s1 + $0x70] ss:$8 sps:$4 sm:$0xff]   ;;  %v1237_v27 = vld [vmem:[%s1693_s1 + $0x154] ss:$8 sps:$4 sm:$0xff]  }
  0x17   : > { %472 = vmatpush1.bf16.msra.mxu0 %v1191_v6  ;;  %544 = vmatprep.subr.bf16.mxu1 %v1219_v16  ;;  %s1139_s16 = smul.u32 192, %s138_s29  ;;  %v1210_v28 = vld [vmem:[%s1693_s1 + $0x84] ss:$8 sps:$4 sm:$0xff]   ;;  %v1239_v29 = vld [vmem:[%s1693_s1 + $0x150] ss:$8 sps:$4 sm:$0xff]   ;;  %s134_s28 = sand.u32 1, %s1341_s10  }
  0x18   : > { %473 = vmatprep.subr.bf16.mxu0 %v1192_v7  ;;  %v1212_v30 = vld [vmem:[%s1693_s1 + $0x80] ss:$8 sps:$4 sm:$0xff]   ;;  %v1243_v31 = vld [vmem:[%s1693_s1 + $0x164] ss:$8 sps:$4 sm:$0xff]   ;;  %v1216_v32 = vld [vmem:[%s1693_s1 + $0x94] ss:$8 sps:$4 sm:$0xff]  }
  0x19   : > { %s1518_s30 = scalar_lea.vmem %s1692_s0, %s1139_s16  ;;  %v1245_v35 = vld [vmem:[%s1693_s1 + $0x160] ss:$8 sps:$4 sm:$0xff]   ;;  %v1218_v37 = vld [vmem:[%s1693_s1 + $0x90] ss:$8 sps:$4 sm:$0xff]   ;;  %v1249_v38 = vld [vmem:[%s1693_s1 + $0x174] ss:$8 sps:$4 sm:$0xff]  }
  0x1a   : > { %545 = vmatpush1.bf16.msra.mxu1 %v1221_v17  ;;  %v144_v33 = vld [vmem:[%s1518_s30 + $0x8] sm:$0xff]  ;;  %v147_v34 = vld [vmem:[%s1518_s30 + $0x20] sm:$0xff]  ;;  %v1251_v40 = vld [vmem:[%s1693_s1 + $0x170] ss:$8 sps:$4 sm:$0xff]   ;;  %s1007_s29 = sshll.u32 %s134_s28, 6  ;;  %s1070_s4 = sshll.u32 %s1392_s13, 10 }
  0x1b   : > { %474 = vmatpush1.bf16.msra.mxu0 %v1194_v8  ;;  %546 = vmatprep.subr.bf16.mxu1 %v1225_v19  ;;  %v168_v36 = vpack.c.bf16 %v147_v34, %v144_v33  ;;  %v1222_v39 = vld [vmem:[%s1693_s1 + $0xa4] ss:$8 sps:$4 sm:$0xff]   ;;  %v145_v41 = vld [vmem:[%s1518_s30 + $0x10] sm:$0xff]  ;;  %v1224_v43 = vld [vmem:[%s1693_s1 + $0xa0] ss:$8 sps:$4 sm:$0xff]   ;;  %s136_s3 = scalar_lea.vmem [#allocation2], %s1007_s29  ;;  %s1644_s8 = scalar_lea.hbm %s1694_s2, %s1070_s4 }
  0x1c   : > { %475 = vmatprep.subr.bf16.mxu0 %v1195_v11  ;;  %v148_v42 = vld [vmem:[%s1518_s30 + $0x28] sm:$0xff]  ;;  %v1228_v44 = vld [vmem:[%s1693_s1 + $0xb4] ss:$8 sps:$4 sm:$0xff]   ;;  %v1230_v46 = vld [vmem:[%s1693_s1 + $0xb0] ss:$8 sps:$4 sm:$0xff]   ;;  %s941_s5 = sshll.u32 %s136_s3, 4  ;;  %s1646_s5 = int_to_ptr.vmem [resolvable:$true] %s941_s5 }
  0x1d   : > { %499 = vmatprep.mubr.bf16.mxu0 %v168_v36  ;;  %v169_v45 = vpack.c.bf16 %v148_v42, %v145_v41  ;;  %v1234_v47 = vld [vmem:[%s1693_s1 + $0xc4] ss:$8 sps:$4 sm:$0xff]   ;;  %v154_v49 = vld [vmem:[%s1518_s30 + $0x58] sm:$0xff]  ;;  %v1236_v50 = vld [vmem:[%s1693_s1 + $0xc0] ss:$8 sps:$4 sm:$0xff]   ;;  %s1651_s13 = scalar_lea.sflag [#allocation3], %s134_s28 }
  0x1e   : > { %547 = vmatpush1.bf16.msra.mxu1 %v1227_v21  ;;  %v151_v48 = vld [vmem:[%s1518_s30 + $0x40] sm:$0xff]  ;;  %v1240_v51 = vld [vmem:[%s1693_s1 + $0xd4] ss:$8 sps:$4 sm:$0xff]   ;;  %v1242_v53 = vld [vmem:[%s1693_s1 + $0xd0] ss:$8 sps:$4 sm:$0xff]   ;;  %s1287_s14 = scalar_lea.vmem %s1646_s5, 1024 }
  0x1f   : > { %476 = vmatpush1.bf16.msra.mxu0 %v1197_v14  ;;  %548 = vmatprep.subr.bf16.mxu1 %v1231_v23  ;;  %v172_v52 = vpack.c.bf16 %v154_v49, %v151_v48  ;;  %v1246_v54 = vld [vmem:[%s1693_s1 + $0xe4] ss:$8 sps:$4 sm:$0xff]   ;;  %v157_v55 = vld [vmem:[%s1518_s30 + $0x70] sm:$0xff]  ;;  %v1248_v57 = vld [vmem:[%s1693_s1 + $0xe0] ss:$8 sps:$4 sm:$0xff]   ;;  %p1288_p11 = scmp.ne.s32.totalorder %s1646_s5, %s1287_s14  ;;  %s1353_s16 = smov [#allocation2]  }
  0x20   : > { %477 = vmatprep.subr.bf16.mxu0 %v1198_v15  ;;  %v160_v56 = vld [vmem:[%s1518_s30 + $0x88] sm:$0xff]  ;;  %v1252_v58 = vld [vmem:[%s1693_s1 + $0xf4] ss:$8 sps:$4 sm:$0xff]   ;;  %v1254_v60 = vld [vmem:[%s1693_s1 + $0xf0] ss:$8 sps:$4 sm:$0xff]   ;;  %s1291_s17 = sshll.u32 %s1353_s16, 4  ;;  %s1292_s17 = int_to_ptr.vmem [resolvable:$false] %s1291_s17 }
  0x21   : > { %v175_v59 = vpack.c.bf16 %v160_v56, %v157_v55  ;;  %v143_v61 = vld [vmem:[%s1518_s30] sm:$0xff]  ;;  %v146_v62 = vld [vmem:[%s1518_s30 + $0x18] sm:$0xff]  ;;  %v153_v0 = vld [vmem:[%s1518_s30 + $0x50] sm:$0xff]  ;;  %p1289_p12 = pnand %p1288_p11, %p1409_p5  ;;  %s1293_s21 = scalar_lea.vmem %s1292_s17, 2048 }
  0x22   : > { %549 = vmatpush1.bf16.msra.mxu1 %v1233_v25  ;;  %v150_v63 = vld [vmem:[%s1518_s30 + $0x38] sm:$0xff]  ;;  %v167_v1 = vpack.c.bf16 %v146_v62, %v143_v61  ;;  %v163_v3 = vld [vmem:[%s1518_s30 + $0xa0] sm:$0xff]  ;;  %v149_v7 = vld [vmem:[%s1518_s30 + $0x30] sm:$0xff]  ;;  %p1294_p0 = scmp.lt.s32.totalorder %s1646_s5, %s1292_s17  ;;  %p1295_p1 = scmp.lt.s32.totalorder %s1293_s21, %s1287_s14 }
  0x23   : > { %478 = vmatpush1.bf16.msra.mxu0 %v1200_v18  ;;  %550 = vmatprep.subr.bf16.mxu1 %v1237_v27  ;;  %v166_v4 = vld [vmem:[%s1518_s30 + $0xb8] sm:$0xff]  ;;  %v171_v5 = vpack.c.bf16 %v153_v0, %v150_v63  ;;  %v152_v8 = vld [vmem:[%s1518_s30 + $0x48] sm:$0xff]  ;;  %v159_v10 = vld [vmem:[%s1518_s30 + $0x80] sm:$0xff]  ;;  %p1290_p13 = pneg %p1289_p12 }
  0x24   : > { %479 = vmatprep.subr.bf16.mxu0 %v1201_v20  ;;  %v178_v6 = vpack.c.bf16 %v166_v4, %v163_v3  ;;  %v156_v9 = vld [vmem:[%s1518_s30 + $0x68] sm:$0xff]  ;;  %v170_v11 = vpack.c.bf16 %v152_v8, %v149_v7  ;;  %v155_v12 = vld [vmem:[%s1518_s30 + $0x60] sm:$0xff]  ;;  %v158_v13 = vld [vmem:[%s1518_s30 + $0x78] sm:$0xff]  ;;  %p1296_p2 = por %p1295_p1, %p1294_p0 }
  0x25   : > { %v162_v14 = vld [vmem:[%s1518_s30 + $0x98] sm:$0xff]  ;;  %v165_v15 = vld [vmem:[%s1518_s30 + $0xb0] sm:$0xff]  ;;  %v173_v16 = vpack.c.bf16 %v158_v13, %v155_v12  ;;  %v164_v19 = vld [vmem:[%s1518_s30 + $0xa8] sm:$0xff] }
  0x26   : > { %551 = vmatpush1.bf16.msra.mxu1 %v1239_v29  ;;  %v177_v17 = vpack.c.bf16 %v165_v15, %v162_v14  ;;  %v161_v18 = vld [vmem:[%s1518_s30 + $0x90] sm:$0xff]  ;;  %s1352_s30 = smov 64   ;;  %p1297_p3 = pnand %p1296_p2, %p1290_p13 }
  0x27   : > { %480 = vmatpush1.bf16.msra.mxu0 %v1203_v22  ;;  %552 = vmatprep.subr.bf16.mxu1 %v1243_v31  ;;  %v176_v20 = vpack.c.bf16 %v164_v19, %v161_v18 }
  0x28   : > { %481 = vmatprep.subr.bf16.mxu0 %v1204_v24 }
  0x2a   : > { %553 = vmatpush1.bf16.msra.mxu1 %v1245_v35 }
  0x2b   : > { %482 = vmatpush1.bf16.msra.mxu0 %v1206_v26  ;;  %554 = vmatprep.subr.bf16.mxu1 %v1249_v38 }
  0x2c   : > { %483 = vmatprep.subr.bf16.mxu0 %v1210_v28 }
  0x2e   : > { %555 = vmatpush1.bf16.msra.mxu1 %v1251_v40 }
  0x2f   : > { %484 = vmatpush1.bf16.msra.mxu0 %v1212_v30 }
  0x30   : > { %485 = vmatprep.subr.bf16.mxu0 %v1216_v32 }
  0x31   : > { %573 = vmatmul.mubr.bf16.vlgmr.msra.gmra.mrb[0].mxu1 %v169_v45 }
  0x32   : > { %582 = vmatprep.mubr.bf16.mxu1 %v1351_v2 }
  0x33   : > { %486 = vmatpush1.bf16.msra.mxu0 %v1218_v37 }
  0x34   : > { %487 = vmatprep.subr.bf16.mxu0 %v1222_v39 }
  0x37   : > { %488 = vmatpush1.bf16.msra.mxu0 %v1224_v43 }
  0x38   : > { %489 = vmatprep.subr.bf16.mxu0 %v1228_v44 }
  0x39   : > { %583 = vmatmul.mubr.bf16.gmra.mrb[4].mxu1 %v172_v52 }
  0x3a   : > { %592 = vmatprep.mubr.bf16.mxu1 %v1351_v2 }
  0x3b   : > { %490 = vmatpush1.bf16.msra.mxu0 %v1230_v46 }
  0x3c   : > { %491 = vmatprep.subr.bf16.mxu0 %v1234_v47 }
  0x3f   : > { %492 = vmatpush1.bf16.msra.mxu0 %v1236_v50 }
  0x40   : > { %493 = vmatprep.subr.bf16.mxu0 %v1240_v51 }
  0x41   : > { %593 = vmatmul.mubr.bf16.gmra.mrb[8].mxu1 %v175_v59 }
  0x42   : > { %602 = vmatprep.mubr.bf16.mxu1 %v1351_v2  ;;  %v174_v2 = vpack.c.bf16 %v159_v10, %v156_v9 }
  0x43   : > { %494 = vmatpush1.bf16.msra.mxu0 %v1242_v53 }
  0x44   : > { %495 = vmatprep.subr.bf16.mxu0 %v1246_v54 }
  0x47   : > { %496 = vmatpush1.bf16.msra.mxu0 %v1248_v57 }
  0x48   : > { %497 = vmatprep.subr.bf16.mxu0 %v1252_v58 }
  0x49   : > { %603 = vmatmul.mubr.bf16.gmra.mrb[12].mxu1 %v178_v6 }
  0x4b   : > { %498 = vmatpush1.bf16.msra.mxu0 %v1254_v60 }
  0x4e   : > { %500 = vmatmul.mubr.bf16.vlgmr.msra.gmra.mrb[0].mxu0 %v167_v1 }
  0x4f   : > { %509 = vmatprep.mubr.bf16.mxu0 %v171_v5 }
  0x56   : > { %510 = vmatmul.mubr.bf16.gmra.mrb[4].mxu0 %v170_v11 }
  0x57   : > { %519 = vmatprep.mubr.bf16.mxu0 %v174_v2 }
  0x5e   : > { %520 = vmatmul.mubr.bf16.gmra.mrb[8].mxu0 %v173_v16 }
  0x5f   : > { %529 = vmatprep.mubr.bf16.mxu0 %v177_v17 }
  0x66   : > { %530 = vmatmul.mubr.bf16.gmra.mrb[12].mxu0 %v176_v20 }
 0x104   : > { %v574_v21 = vpop.f32.mrb[0].mxu1 }
 0x105   : > { %v576_v22 = vpop.f32.mrb[1].mxu1 }
 0x106   : > { %v578_v23 = vpop.f32.mrb[2].mxu1 }
 0x107   : > { %v580_v24 = vpop.f32.mrb[3].mxu1 }
 0x10c   : > { %v584_v25 = vpop.f32.mrb[4].mxu1 }
 0x10d   : > { %v586_v26 = vpop.f32.mrb[5].mxu1 }
 0x10e   : > { %v588_v27 = vpop.f32.mrb[6].mxu1 }
 0x10f   : > { %v590_v28 = vpop.f32.mrb[7].mxu1 }
 0x114   : > { %v594_v29 = vpop.f32.mrb[8].mxu1 }
 0x115   : > { %v596_v30 = vpop.f32.mrb[9].mxu1 }
 0x116   : > { %v598_v31 = vpop.f32.mrb[10].mxu1 }
 0x117   : > { %v600_v32 = vpop.f32.mrb[11].mxu1 }
 0x11c   : > { %v604_v40 = vpop.f32.mrb[12].mxu1 }
 0x11d   : > { %v606_v42 = vpop.f32.mrb[13].mxu1 }
 0x11e   : > { %v608_v44 = vpop.f32.mrb[14].mxu1 }
 0x11f   : > { %v610_v46 = vpop.f32.mrb[15].mxu1 }
 0x121   : > { %v501_v33 = vpop.f32.mrb[0].mxu0 }
 0x122   : > { %v575_v34 = vadd.f32 %v574_v21, %v501_v33  ;;  %v503_v35 = vpop.f32.mrb[1].mxu0  ;;  %v723_v21 = vlaneseq }
 0x123   : > { %v577_v36 = vadd.f32 %v576_v22, %v503_v35  ;;  %v505_v37 = vpop.f32.mrb[2].mxu0 }
 0x124   : > { %v579_v38 = vadd.f32 %v578_v23, %v505_v37  ;;  %v507_v39 = vpop.f32.mrb[3].mxu0  ;;  %v724_v22 = vshrl.u32 %v723_v21, 7  ;;  %v733_v23 = vand.u32 127, %v723_v21 }
 0x125   : > { %v581_v41 = vadd.f32 %v580_v24, %v507_v39 }
 0x126   : > { %v613_v43 = vpack.c.bf16 %v579_v38, %v575_v34  ;;  %v726_v24 = vadd.s32 16, %v724_v22  ;;  %vm734_vm1 = vcmp.ge.s32.totalorder %v724_v22, %v733_v23  ;;  %v728_v33 = vadd.s32 32, %v724_v22 }
 0x127   : > { %v617_v45 = vpack.c.bf16 %v581_v41, %v577_v36  ;;  %v730_v37 = vadd.s32 48, %v724_v22  ;;  %v729_v38 = vadd.s32 40, %v724_v22 }
 0x128   : > { %625 = vrot.lane.b32.xlu0 %v613_v43, %s1352_s30  ;;  %1095 = vmatprep.mubr.msk.bf16.mxu1 %vm633_vm0, %v613_v43  ;;  %vm736_vm2 = vcmp.ge.s32.totalorder %v726_v24, %v733_v23  ;;  %vm738_vm5 = vcmp.ge.s32.totalorder %v728_v33, %v733_v23  ;;  %v731_v43 = vadd.s32 56, %v724_v22 }
 0x129   : > { %v511_v47 = vpop.f32.mrb[4].mxu0  ;;  %vm740_vm6 = vcmp.ge.s32.totalorder %v730_v37, %v733_v23  ;;  %vm739_vm7 = vcmp.ge.s32.totalorder %v729_v38, %v733_v23 }
 0x12a   : > { %v585_v48 = vadd.f32 %v584_v25, %v511_v47  ;;  %v513_v49 = vpop.f32.mrb[5].mxu0  ;;  %v725_v25 = vadd.s32 8, %v724_v22  ;;  %vm741_vm8 = vcmp.ge.s32.totalorder %v731_v43, %v733_v23 }
 0x12b   : > { %v587_v50 = vadd.f32 %v586_v26, %v513_v49  ;;  %v515_v51 = vpop.f32.mrb[6].mxu0 }
 0x12c   : > { %v589_v52 = vadd.f32 %v588_v27, %v515_v51  ;;  %v517_v53 = vpop.f32.mrb[7].mxu0  ;;  %vm735_vm3 = vcmp.ge.s32.totalorder %v725_v25, %v733_v23 }
 0x12d   : > { %v591_v54 = vadd.f32 %v590_v28, %v517_v53  ;;  %v727_v28 = vadd.s32 24, %v724_v22 }
 0x12e   : > { %v614_v55 = vpack.c.bf16 %v589_v52, %v585_v48 }
 0x12f   : > { %v618_v56 = vpack.c.bf16 %v591_v54, %v587_v50  ;;  %vm737_vm4 = vcmp.ge.s32.totalorder %v727_v28, %v733_v23 }
 0x130   : > { %627 = vrot.lane.b32.xlu0 %v614_v55, %s1352_s30 }
 0x131   : > { %v521_v57 = vpop.f32.mrb[8].mxu0 }
 0x132   : > { %v595_v58 = vadd.f32 %v594_v29, %v521_v57  ;;  %v523_v59 = vpop.f32.mrb[9].mxu0 }
 0x133   : > { %v597_v60 = vadd.f32 %v596_v30, %v523_v59  ;;  %v525_v61 = vpop.f32.mrb[10].mxu0 }
 0x134   : > { %v599_v62 = vadd.f32 %v598_v31, %v525_v61  ;;  %v527_v63 = vpop.f32.mrb[11].mxu0 }
 0x135   : > { %v601_v0 = vadd.f32 %v600_v32, %v527_v63 }
 0x136   : > { %v615_v1 = vpack.c.bf16 %v599_v62, %v595_v58 }
 0x137   : > { %v619_v3 = vpack.c.bf16 %v601_v0, %v597_v60 }
 0x138   : > { %629 = vrot.lane.b32.xlu1 %v615_v1, %s1352_s30 }
 0x139   : > { %v531_v4 = vpop.f32.mrb[12].mxu0 }
 0x13a   : > { %v605_v5 = vadd.f32 %v604_v40, %v531_v4  ;;  %v533_v6 = vpop.f32.mrb[13].mxu0 }
 0x13b   : > { %v607_v7 = vadd.f32 %v606_v42, %v533_v6  ;;  %v535_v8 = vpop.f32.mrb[14].mxu0 }
 0x13c   : > { %v609_v9 = vadd.f32 %v608_v44, %v535_v8  ;;  %v537_v10 = vpop.f32.mrb[15].mxu0 }
 0x13d   : > { %v611_v11 = vadd.f32 %v610_v46, %v537_v10 }
 0x13e   : > { %v616_v2 = vpack.c.bf16 %v609_v9, %v605_v5 }
 0x13f   : > { %v620_v12 = vpack.c.bf16 %v611_v11, %v607_v7 }
 0x140   : > { %631 = vrot.lane.b32.xlu1 %v616_v2, %s1352_s30 }
 0x19a   : > { %v626_v13 = vpop.permute.xlu0 %625 }
 0x19b   : > { %v647_v14 = vsel %vm633_vm0, %v626_v13, 0  ;;  %1135 = vmatprep.subr.msk.bf16.mxu1 %vm633_vm0, %v626_v13 }
 0x19c   : > { %1088 = vmatpush3.bf16.xpose.msra.mxu1 %v647_v14 }
 0x1a2   : > { %v628_v15 = vpop.permute.xlu0 %627 }
 0x1a3   : > { %v650_v16 = vsel %vm633_vm0, %v628_v15, 0  ;;  %1136 = vmatprep.subr.msk.bf16.mxu1 %vm633_vm0, %v628_v15 }
 0x1a4   : > { %1090 = vmatpush3.bf16.xpose.msra.mxu1 %v650_v16 }
 0x1aa   : > { %v630_v17 = vpop.permute.xlu1 %629 }
 0x1ab   : > { %v653_v18 = vsel %vm633_vm0, %v630_v17, 0  ;;  %1137 = vmatprep.subr.msk.bf16.mxu1 %vm633_vm0, %v630_v17 }
 0x1ac   : > { %1092 = vmatpush3.bf16.xpose.msra.mxu1 %v653_v18 }
 0x1b2   : > { %v632_v19 = vpop.permute.xlu1 %631 }
 0x1b3   : > { %v656_v20 = vsel %vm633_vm0, %v632_v19, 0  ;;  %1138 = vmatprep.subr.msk.bf16.mxu1 %vm633_vm0, %v632_v19 }
 0x1b4   : > { %1094 = vmatpush3.bf16.xpose.msra.mxu1 %v656_v20 }
 0x1b5   : > { %1103 = vmatprep.subr.bf16.mxu1 %v617_v45 }
 0x1bb   : > { %1096 = vmatmul.mubr.msk.bf16.vlgmr.msra.gmra.mrb[16].mxu1 %vm633_vm0, %v614_v55 }
 0x1bc   : > { %1099 = vmatprep.mubr.msk.bf16.mxu1 %vm633_vm0, %v615_v1  ;;  %1104 = vmatpush3.bf16.msra.mxu1 %v617_v45 }
 0x1bd   : > { %1105 = vmatprep.subr.bf16.mxu1 %v618_v56 }
 0x1c0   : > { %1106 = vmatpush3.bf16.msra.mxu1 %v618_v56 }
 0x1c1   : > { %1107 = vmatprep.subr.bf16.mxu1 %v619_v3 }
 0x1c3   : > { %1100 = vmatmul.mubr.msk.bf16.gmra.mrb[20].mxu1 %vm633_vm0, %v616_v2 }
 0x1c4   : > { %1108 = vmatpush3.bf16.msra.mxu1 %v619_v3 }
 0x1c5   : > { %1109 = vmatprep.subr.bf16.mxu1 %v620_v12 }
 0x1c8   : > { %1110 = vmatpush3.bf16.msra.mxu1 %v620_v12 }
 0x28e   : > { %v1097_v26 = vpop.f32.mrb[16].mxu1 }
 0x28f   : > { %v692_v27 = vpop.f32.mrb[17].mxu1  ;;  %v744_v34 = vsel %vm736_vm2, %v1097_v26, -1e+30 }
 0x290   : > { %v742_v29 = vsel %vm734_vm1, %v692_v27, -1e+30  ;;  %v1098_v30 = vpop.f32.mrb[18].mxu1  ;;  %v756_v39 = vsel %vm633_vm0, %v744_v34, -inf }
 0x291   : > { %v695_v31 = vpop.f32.mrb[19].mxu1  ;;  %v750_v32 = vsel %vm633_vm0, %v742_v29, -inf  ;;  %v745_v40 = vsel %vm737_vm4, %v1098_v30, -1e+30 }
 0x292   : > { %v743_v35 = vsel %vm735_vm3, %v695_v31, -1e+30  ;;  %751 = vmax.xlane.f32.xlu0 %v750_v32  ;;  %v759_v47 = vsel %vm633_vm0, %v745_v40, -inf }
 0x293   : > { %v753_v36 = vsel %vm633_vm0, %v743_v35, -inf }
 0x294   : > { %754 = vmax.xlane.f32.xlu1 %v753_v36 }
 0x296   : > { %757 = vmax.xlane.f32.xlu0 %v756_v39  ;;  %v1101_v41 = vpop.f32.mrb[20].mxu1 }
 0x297   : > { %v708_v42 = vpop.f32.mrb[21].mxu1  ;;  %v748_v49 = vsel %vm740_vm6, %v1101_v41, -1e+30 }
 0x298   : > { %v746_v44 = vsel %vm738_vm5, %v708_v42, -1e+30  ;;  %v1102_v45 = vpop.f32.mrb[22].mxu1  ;;  %v768_v51 = vsel %vm633_vm0, %v748_v49, -inf }
 0x299   : > { %v711_v46 = vpop.f32.mrb[23].mxu1  ;;  %v762_v48 = vsel %vm633_vm0, %v746_v44, -inf  ;;  %v749_v53 = vsel %vm741_vm8, %v1102_v45, -1e+30 }
 0x29a   : > { %v747_v50 = vsel %vm739_vm7, %v711_v46, -1e+30  ;;  %760 = vmax.xlane.f32.xlu0 %v759_v47  ;;  %763 = vmax.xlane.f32.xlu1 %v762_v48  ;;  %v771_v54 = vsel %vm633_vm0, %v749_v53, -inf }
 0x29b   : > { %v765_v52 = vsel %vm633_vm0, %v747_v50, -inf }
 0x29e   : > { %769 = vmax.xlane.f32.xlu1 %v768_v51  ;;  %766 = vmax.xlane.f32.xlu0 %v765_v52 }
 0x2a2   : > { %772 = vmax.xlane.f32.xlu0 %v771_v54 }
 0x31f   : > { %v752_v55 = vpop.xlane.xlu0 %751 }
 0x320   : > { %v774_v56 = vsub.f32 %v742_v29, %v752_v55 }
 0x321   : > { %v755_v57 = vpop.xlane.xlu1 %754 }
 0x322   : > { %v782_v58 = vmul.f32 1.442695, %v774_v56  ;;  %v775_v59 = vsub.f32 %v743_v35, %v755_v57 }
 0x323   : > { %v758_v60 = vpop.xlane.xlu0 %757 }
 0x324   : > { %1255 = vpow2.f32 %v782_v58  ;;  %v784_v61 = vmul.f32 1.442695, %v775_v59  ;;  %v776_v62 = vsub.f32 %v744_v34, %v758_v60 }
 0x326   : > { %1257 = vpow2.f32 %v784_v61  ;;  %v786_v63 = vmul.f32 1.442695, %v776_v62 }
 0x327   : > { %v761_v0 = vpop.xlane.xlu0 %760  ;;  %v764_v1 = vpop.xlane.xlu1 %763 }
 0x328   : > { %1259 = vpow2.f32 %v786_v63  ;;  %v777_v3 = vsub.f32 %v745_v40, %v761_v0  ;;  %v778_v4 = vsub.f32 %v746_v44, %v764_v1 }
 0x32a   : > { %v788_v5 = vmul.f32 1.442695, %v777_v3  ;;  %v790_v6 = vmul.f32 1.442695, %v778_v4 }
 0x32b   : > { %v770_v7 = vpop.xlane.xlu1 %769  ;;  %v767_v8 = vpop.xlane.xlu0 %766 }
 0x32c   : > { %1261 = vpow2.f32 %v788_v5  ;;  %v780_v9 = vsub.f32 %v748_v49, %v770_v7  ;;  %v779_v10 = vsub.f32 %v747_v50, %v767_v8 }
 0x32d   : > { %1263 = vpow2.f32 %v790_v6 }
 0x32e   : > { %v1256_v11 = vpop.eup %1255  ;;  %v794_v2 = vmul.f32 1.442695, %v780_v9  ;;  %v792_v12 = vmul.f32 1.442695, %v779_v10 }
 0x32f   : > { %v773_v13 = vpop.xlane.xlu0 %772  ;;  %v798_v14 = vsel %vm633_vm0, %v1256_v11, 0.0 }
 0x330   : > { %v1258_v15 = vpop.eup %1257  ;;  %1265 = vpow2.f32 %v794_v2  ;;  %v781_v16 = vsub.f32 %v749_v53, %v773_v13  ;;  %799 = vadd.xlane.f32.xlu1 %v798_v14 }
 0x331   : > { %1267 = vpow2.f32 %v792_v12  ;;  %v801_v17 = vsel %vm633_vm0, %v1258_v15, 0.0 }
 0x332   : > { %v1260_v18 = vpop.eup %1259  ;;  %v796_v19 = vmul.f32 1.442695, %v781_v16  ;;  %802 = vadd.xlane.f32.xlu0 %v801_v17 }
 0x333   : > { %v804_v20 = vsel %vm633_vm0, %v1260_v18, 0.0 }
 0x334   : > { %1269 = vpow2.f32 %v796_v19  ;;  %805 = vadd.xlane.f32.xlu1 %v804_v20 }
 0x336   : > { %v1262_v21 = vpop.eup %1261 }
 0x337   : > { %v1264_v22 = vpop.eup %1263  ;;  %v807_v23 = vsel %vm633_vm0, %v1262_v21, 0.0 }
 0x338   : > { %v810_v24 = vsel %vm633_vm0, %v1264_v22, 0.0  ;;  %808 = vadd.xlane.f32.xlu0 %v807_v23 }
 0x339   : > { %811 = vadd.xlane.f32.xlu1 %v810_v24 }
 0x33a   : > { %v1266_v25 = vpop.eup %1265 }
 0x33b   : > { %v1268_v26 = vpop.eup %1267  ;;  %v816_v27 = vsel %vm633_vm0, %v1266_v25, 0.0 }
 0x33c   : > { %v813_v28 = vsel %vm633_vm0, %v1268_v26, 0.0 }
 0x33d   : > { %817 = vadd.xlane.f32.xlu1 %v816_v27  ;;  %814 = vadd.xlane.f32.xlu0 %v813_v28 }
 0x33e   : > { %v1270_v29 = vpop.eup %1269 }
 0x33f   : > { %v819_v30 = vsel %vm633_vm0, %v1270_v29, 0.0 }
 0x341   : > { %820 = vadd.xlane.f32.xlu0 %v819_v30 }
 0x3bd   : > { %v800_v31 = vpop.xlane.xlu1 %799 }
 0x3be   : > { %1271 = vrcp.f32 %v800_v31 }
 0x3bf   : > { %v803_v32 = vpop.xlane.xlu0 %802 }
 0x3c0   : > { %1273 = vrcp.f32 %v803_v32 }
 0x3c1   : > { %v806_v33 = vpop.xlane.xlu1 %805 }
 0x3c2   : > { %1275 = vrcp.f32 %v806_v33 }
 0x3c5   : > { %v809_v34 = vpop.xlane.xlu0 %808 }
 0x3c6   : > { %v812_v35 = vpop.xlane.xlu1 %811  ;;  %1277 = vrcp.f32 %v809_v34 }
 0x3c7   : > { %1279 = vrcp.f32 %v812_v35 }
 0x3c8   : > { %v1272_v36 = vpop.eup %1271 }
 0x3c9   : > { %v830_v40 = vmul.f32 %v1272_v36, %v1256_v11 }
 0x3ca   : > { %v1274_v37 = vpop.eup %1273  ;;  %v818_v38 = vpop.xlane.xlu1 %817 }
 0x3cb   : > { %v815_v39 = vpop.xlane.xlu0 %814  ;;  %v831_v41 = vmul.f32 %v1274_v37, %v1258_v15 }
 0x3cc   : > { %1281 = vrcp.f32 %v815_v39  ;;  %v1276_v43 = vpop.eup %1275 }
 0x3cd   : > { %1283 = vrcp.f32 %v818_v38  ;;  %v838_v42 = vpack.c.bf16 %v831_v41, %v830_v40  ;;  %v832_v46 = vmul.f32 %v1276_v43, %v1260_v18 }
 0x3cf   : > { %v821_v44 = vpop.xlane.xlu0 %820  ;;  %1111 = vmatprep.mubr.msk.bf16.mxu1 %vm633_vm0, %v838_v42 }
 0x3d0   : > { %1285 = vrcp.f32 %v821_v44  ;;  %v1278_v45 = vpop.eup %1277 }
 0x3d1   : > { %v833_v47 = vmul.f32 %v1278_v45, %v1262_v21  ;;  %v1280_v49 = vpop.eup %1279 }
 0x3d2   : > { %v834_v52 = vmul.f32 %v1280_v49, %v1264_v22 }
 0x3d3   : > { %v839_v48 = vpack.c.bf16 %v833_v47, %v832_v46 }
 0x3d5   : > { %1112 = vmatmul.mubr.msk.bf16.vlgmr.msra.gmra.mrb[24].mxu1 %vm633_vm0, %v839_v48 }
 0x3d6   : > { %v1282_v50 = vpop.eup %1281 }
 0x3d7   : > { %v1284_v51 = vpop.eup %1283  ;;  %v835_v53 = vmul.f32 %v1282_v50, %v1268_v26 }
 0x3d8   : > { %v836_v56 = vmul.f32 %v1284_v51, %v1266_v25 }
 0x3d9   : > { %v840_v55 = vpack.c.bf16 %v835_v53, %v834_v52 }
 0x3da   : > { %v1286_v54 = vpop.eup %1285 }
 0x3db   : > { %v837_v57 = vmul.f32 %v1286_v54, %v1270_v29  ;;  %1115 = vmatprep.mubr.msk.bf16.mxu1 %vm633_vm0, %v840_v55 }
 0x3dd   : > { %v841_v58 = vpack.c.bf16 %v837_v57, %v836_v56 }
 0x3df   : > { %1116 = vmatmul.mubr.msk.bf16.gmra.mrb[28].mxu1 %vm633_vm0, %v841_v58 }
 0x4a8   : > { %v1113_v59 = vpop.f32.mrb[24].mxu1 }
 0x4a9   : > { %921 = vst.msk [vmem:[%s136_s3 + $0x10] sm:$0xff] %vm633_vm0, %v1113_v59  ;;  %v888_v60 = vpop.f32.mrb[25].mxu1 }
 0x4aa   : > { %919 = vst.msk [vmem:[%s136_s3] sm:$0xff] %vm633_vm0, %v888_v60  ;;  %v1114_v61 = vpop.f32.mrb[26].mxu1 }
 0x4ab   : > { %922 = vst.msk [vmem:[%s136_s3 + $0x18] sm:$0xff] %vm633_vm0, %v1114_v61  ;;  %v891_v62 = vpop.f32.mrb[27].mxu1 }
 0x4ac   : > { %920 = vst.msk [vmem:[%s136_s3 + $0x8] sm:$0xff] %vm633_vm0, %v891_v62 }
 0x4b2   : > { %v1117_v63 = vpop.f32.mrb[28].mxu1 }
 0x4b3   : > { %925 = vst.msk [vmem:[%s136_s3 + $0x30] sm:$0xff] %vm633_vm0, %v1117_v63  ;;  %v904_v0 = vpop.f32.mrb[29].mxu1 }
 0x4b4   : > { %923 = vst.msk [vmem:[%s136_s3 + $0x20] sm:$0xff] %vm633_vm0, %v904_v0  ;;  %v1118_v1 = vpop.f32.mrb[30].mxu1 }
 0x4b5   : > { %926 = vst.msk [vmem:[%s136_s3 + $0x38] sm:$0xff] %vm633_vm0, %v1118_v1  ;;  %v907_v3 = vpop.f32.mrb[31].mxu1 }
 0x4b6   : > { %924 = vst.msk [vmem:[%s136_s3 + $0x28] sm:$0xff] %vm633_vm0, %v907_v3 }
 0x4b7   : > { %1300 = shalt.err (!%p1297_p3)
}
 0x4b8   : > { %s1301_s22 = scalar_lea.hbm %s1644_s8, 1024  ;;  %s1305_s25 = scalar_lea.hbm %s1694_s2, 2048 }
 0x4b9   : > { %p1302_p4 = scmp.ne.s32.totalorder %s1644_s8, %s1301_s22  ;;  %p1306_p9 = scmp.lt.u32.totalorder %s1644_s8, %s1694_s2 }
 0x4ba   : > { %p1307_p10 = scmp.lt.u32.totalorder %s1305_s25, %s1301_s22  ;;  %p1309_p12 = scmp.lt.u32.totalorder %s1301_s22, %s1644_s8 }
 0x4bb   : > { %p1303_p7 = pnand %p1302_p4, %p1409_p5 }
 0x4bc   : > { %p1308_p11 = por %p1307_p10, %p1306_p9 }
 0x4bd   : > { %p1304_p8 = pneg %p1303_p7 }
 0x4be   : > { %p1310_p13 = por %p1309_p12, %p1308_p11 }
 0x4c0   : > { %p1311_p0 = pnand %p1310_p13, %p1304_p8 }
 0x4c2   : > { %1314 = shalt.err (!%p1311_p0)
}
 0x4c3   : > { %s1354_s30 = smov 128   ;;  %s1355_s28 = smov 8  }
 0x4c4   : > { %1140 = dma.vmem_to_hbm [thread:$0]  (%p1409_p5), %s1646_s5, 1024, %s1644_s8, %s1651_s13, %s1354_s30, %s1354_s30, %s1355_s28  }
 0x4c5 PF: > { %p1146_p1 = scmp.ge.s32.totalorder %s1349_s12, 2  ;;  %s956_s29 = sand.u32 1, %s1337_s9  }
 0x4c6   : > { %s957_s3 = scalar_lea.sflag [#allocation3], %s956_s29 }
 0x4c7   : > { %p1143_p2 = pnand %p1146_p1, %p1413_p6 }
 0x4c9   : > { %1332 = dma.done.wait (!%p1143_p2), %s957_s3, 1024  }
 0x4ca   : > { %1334 = vsyncadd (!%p1143_p2), %s957_s3, 4294966272  ;;  %p12_p3 = scmp.ge.s32.totalorder %s1396_s15, 4   ;;  %s1697_s9 = smov %s1341_s10 }
 0x4cb   : > { %s1698_s10 = smov %s1345_s11  ;;  %s1699_s11 = smov %s1407_s18 }
 0x4cc   : > { %s1700_s12 = smov %s1396_s15  ;;  %14 = sbr.rel (!%p12_p3) target bundleno = 3 (0x3), region = 63 }
 0x4d3   :  { %962 = vsyncpa [#allocation3], 1 }
 0x4d4   :  { %964 = vsyncpa [#allocation3 + $0x1], 1 }

</bundles_post_ra>
